<compile_context>
chip_gen: v7x
topology: tpu7x:2x2x1
jax: 0.10.0
libtpu: 0.0.40
codegen_flags: <defaults>
</compile_context>

<pallas_src>
import functools

import jax
import jax.numpy as jnp
from jax.experimental import pallas as pl
from jax.experimental.pallas import tpu as pltpu

LOG_SIG_MAX = 2.0
LOG_SIG_MIN = -5.0
MEAN_MAX = 9.0
MEAN_MIN = -9.0


def _round_up(x: int, m: int) -> int:
    return (x + m - 1) // m * m


def _silu(z):
    # z * sigmoid(z), f32 elementwise (EUP exp + VPU)
    return z * (1.0 / (1.0 + jnp.exp(-z)))


def _make_policy_kernel(num_layers: int, cont_action_dim: int):
    """Fused MLP-policy kernel.

    refs layout: x, (w0, b0), ..., (w_{L-1}, b_{L-1}), w_heads, b_heads, out
    Weights are bf16, biases f32, activations f32 (cast to bf16 at dot inputs).
    Output is a lane-dense (tile_b, P) f32 block:
      cols [0, A)        -> clamped mean
      cols [A, 2A)       -> std = exp(clamped log_std)
      cols [2A, ...)     -> raw logits (gripper head) / zero padding
    """

    def kernel(x_ref, *refs):
        out_ref = refs[-1]
        prm = refs[:-1]

        h = x_ref[...]  # f32
        for i in range(num_layers):
            w = prm[2 * i][...]
            b = prm[2 * i + 1][...]
            z = jnp.dot(h.astype(w.dtype), w,
                        preferred_element_type=jnp.float32) + b
            h = _silu(z)

        wh = prm[2 * num_layers][...]
        bh = prm[2 * num_layers + 1][...]
        y = jnp.dot(h.astype(wh.dtype), wh,
                    preferred_element_type=jnp.float32) + bh

        col = jax.lax.broadcasted_iota(jnp.int32, y.shape, 1)
        mean_b = jnp.clip(y, MEAN_MIN, MEAN_MAX)
        std_b = jnp.exp(jnp.clip(y, LOG_SIG_MIN, LOG_SIG_MAX))
        out_ref[...] = jnp.where(
            col < cont_action_dim, mean_b,
            jnp.where(col < 2 * cont_action_dim, std_b, y))

    return kernel


def mlp_policy_forward(policy_input, params, *, discrete_gripper=False,
                       tile_b=None):
    """JAX wrapper around the fused Pallas policy kernel."""
    layers = params["layers"]          # list of (w: (in,out) f32, b: (1,out) f32)
    wm, bm = params["mean"]
    ws, bs = params["log_std"]
    num_layers = len(layers)

    batch, input_dim = policy_input.shape
    hidden = layers[-1][0].shape[1]
    a_cont = wm.shape[1]

    # ---- fuse output heads into one lane-dense (hidden, P) matmul ----------
    head_w = [wm, ws]
    head_b = [bm, bs]
    if discrete_gripper:
        wg, bg = params["gripper"]
        head_w.append(wg)
        head_b.append(bg)
    wh = jnp.concatenate(head_w, axis=1)
    bh = jnp.concatenate(head_b, axis=1)
    head_dim = wh.shape[1]
    p = _round_up(max(head_dim, 1), 128)       # pad to full lane width
    if p > head_dim:
        wh = jnp.pad(wh, ((0, 0), (0, p - head_dim)))
        bh = jnp.pad(bh, ((0, 0), (0, p - head_dim)))

    # bf16 weights (MXU fast path, halves weight DMA); biases stay f32
    kernel_args = []
    for (w, b) in layers:
        kernel_args += [w.astype(jnp.bfloat16), b.astype(jnp.float32)]
    kernel_args += [wh.astype(jnp.bfloat16), bh.astype(jnp.float32)]

    # ---- batch tiling (multiples of 16 rows: bf16 packs 2 rows / sublane) ---
    if tile_b is None:
        tile_b = min(256, _round_up(batch, 16))
    b_pad = _round_up(batch, tile_b)
    x = policy_input.astype(jnp.float32)
    if b_pad > batch:
        x = jnp.pad(x, ((0, b_pad - batch), (0, 0)))

    grid = (b_pad // tile_b,)
    x_spec = pl.BlockSpec((tile_b, input_dim), lambda i: (i, 0))
    # weights/biases: same block every grid step -> stay resident in VMEM
    weight_specs = [pl.BlockSpec(a.shape, lambda i: (0, 0))
                    for a in kernel_args]
    out_spec = pl.BlockSpec((tile_b, p), lambda i: (i, 0))

    flops = 2 * b_pad * (input_dim * hidden
                         + (num_layers - 1) * hidden * hidden
                         + hidden * p)
    transcendentals = b_pad * (num_layers * hidden + p)
    bytes_accessed = (x.size * x.dtype.itemsize
                      + sum(a.size * a.dtype.itemsize for a in kernel_args)
                      + b_pad * p * 4)

    out = pl.pallas_call(
        _make_policy_kernel(num_layers, a_cont),
        out_shape=jax.ShapeDtypeStruct((b_pad, p), jnp.float32),
        grid=grid,
        in_specs=[x_spec] + weight_specs,
        out_specs=out_spec,
        compiler_params=pltpu.CompilerParams(
            dimension_semantics=("parallel",)),
        cost_estimate=pl.CostEstimate(
            flops=flops,
            transcendentals=transcendentals,
            bytes_accessed=bytes_accessed),
    )(x, *kernel_args)

    mean = out[:batch, :a_cont]
    std = out[:batch, a_cont:2 * a_cont]
    if discrete_gripper:
        grip_logits = out[:batch, 2 * a_cont:2 * a_cont + 2]
        return mean, std, grip_logits
    return mean, std


# ----------------------------- reference + test ------------------------------


def _linear_default(key, fan_in, fan_out):
    """torch.nn.Linear default init: uniform(+/- 1/sqrt(fan_in))."""
    kw, kb = jax.random.split(key)
    bound = 1.0 / jnp.sqrt(float(fan_in))
    w = jax.random.uniform(kw, (fan_in, fan_out), jnp.float32, -bound, bound)
    b = jax.random.uniform(kb, (1, fan_out), jnp.float32, -bound, bound)
    return w, b


def _linear_small(key, fan_in, fan_out, init_w):
    """Head init: uniform(+/- init_w) as in MLPPolicy.__init__."""
    kw, kb = jax.random.split(key)
    w = jax.random.uniform(kw, (fan_in, fan_out), jnp.float32, -init_w, init_w)
    b = jax.random.uniform(kb, (1, fan_out), jnp.float32, -init_w, init_w)
    return w, b


def _reference_forward(x, params, discrete_gripper=False):
    """Plain-JAX reference mirroring the kernel's bf16-matmul / f32-accum math."""

    def dot(a, w):
        return jnp.dot(a.astype(jnp.bfloat16), w.astype(jnp.bfloat16),
                       preferred_element_type=jnp.float32)

    h = x.astype(jnp.float32)
    for (w, b) in params["layers"]:
        h = _silu(dot(h, w) + b)
    mean = jnp.clip(dot(h, params["mean"][0]) + params["mean"][1],
                    MEAN_MIN, MEAN_MAX)
    log_std = jnp.clip(dot(h, params["log_std"][0]) + params["log_std"][1],
                       LOG_SIG_MIN, LOG_SIG_MAX)
    std = jnp.exp(log_std)
    if discrete_gripper:
        grip = dot(h, params["gripper"][0]) + params["gripper"][1]
        return mean, std, grip
    return mean, std


if __name__ == "__main__":
    # Small shapes consistent with the module (defaults scaled down).
    batch = 8
    input_dim = 32
    hidden_dim = 64
    action_dim = 8
    num_layers = 2
    init_w = 0.001

    key = jax.random.PRNGKey(0)
    kx, kl1, kl2, km, ks, kg = jax.random.split(key, 6)

    policy_input = jax.random.normal(kx, (batch, input_dim), jnp.float32)

    fwd = jax.jit(mlp_policy_forward,
                  static_argnames=("discrete_gripper", "tile_b"))

    # ---- case 1: discrete_gripper = False (module default) ----
    params = {
        "layers": [_linear_default(kl1, input_dim, hidden_dim),
                   _linear_default(kl2, hidden_dim, hidden_dim)],
        "mean": _linear_small(km, hidden_dim, action_dim, init_w),
        "log_std": _linear_small(ks, hidden_dim, action_dim, init_w),
    }
    mean, std = fwd(policy_input, params)
    jax.block_until_ready((mean, std))
    mean_ref, std_ref = _reference_forward(policy_input, params)
    assert mean.shape == (batch, action_dim) and std.shape == (batch, action_dim)
    assert jnp.allclose(mean, mean_ref, atol=5e-3, rtol=5e-3)
    assert jnp.allclose(std, std_ref, atol=5e-3, rtol=5e-3)
    assert bool(jnp.all(std > 0))

    # ---- case 2: discrete_gripper = True (cont_action_dim = action_dim - 1) ----
    a_cont = action_dim - 1
    params_g = {
        "layers": params["layers"],
        "mean": _linear_small(km, hidden_dim, a_cont, init_w),
        "log_std": _linear_small(ks, hidden_dim, a_cont, init_w),
        "gripper": _linear_small(kg, hidden_dim, 2, init_w),
    }
    mean_g, std_g, grip = fwd(policy_input, params_g, discrete_gripper=True)
    jax.block_until_ready((mean_g, std_g, grip))
    mr, sr, gr = _reference_forward(policy_input, params_g, discrete_gripper=True)
    assert mean_g.shape == (batch, a_cont) and grip.shape == (batch, 2)
    assert jnp.allclose(mean_g, mr, atol=5e-3, rtol=5e-3)
    assert jnp.allclose(std_g, sr, atol=5e-3, rtol=5e-3)
    assert jnp.allclose(grip, gr, atol=5e-3, rtol=5e-3)

    # TODO(synk): downstream distribution utilities (TanhNormal sampling,
    # log_prob) live outside this module's forward and are not kernelized.
    print("KERNEL_OK")
</pallas_src>

<mosaic_0001>
module attributes {stable_mosaic.version = 11 : i64} {
  func.func @kernel(%arg0: i32, %arg1: memref<16x32xf32, #tpu.memory_space<vmem>>, %arg2: memref<32x64xbf16, #tpu.memory_space<vmem>>, %arg3: memref<1x64xf32, #tpu.memory_space<vmem>>, %arg4: memref<64x64xbf16, #tpu.memory_space<vmem>>, %arg5: memref<1x64xf32, #tpu.memory_space<vmem>>, %arg6: memref<64x128xbf16, #tpu.memory_space<vmem>>, %arg7: memref<1x128xf32, #tpu.memory_space<vmem>>, %arg8: memref<16x128xf32, #tpu.memory_space<vmem>>) attributes {dimension_semantics = [#tpu.dimension_semantics<parallel>], iteration_bounds = array<i64: 1>, scalar_prefetch = 0 : i64, scratch_operands = 0 : i64, tpu.core_type = #tpu.core_type<tc>, window_params = [{transform_indices = @transform_0, window_bounds = array<i64: 16, 32>}, {pipeline_mode = #tpu.pipeline_mode<synchronous>, transform_indices = @transform_1, window_bounds = array<i64: 32, 64>}, {pipeline_mode = #tpu.pipeline_mode<synchronous>, transform_indices = @transform_2, window_bounds = array<i64: 1, 64>}, {pipeline_mode = #tpu.pipeline_mode<synchronous>, transform_indices = @transform_3, window_bounds = array<i64: 64, 64>}, {pipeline_mode = #tpu.pipeline_mode<synchronous>, transform_indices = @transform_4, window_bounds = array<i64: 1, 64>}, {pipeline_mode = #tpu.pipeline_mode<synchronous>, transform_indices = @transform_5, window_bounds = array<i64: 64, 128>}, {pipeline_mode = #tpu.pipeline_mode<synchronous>, transform_indices = @transform_6, window_bounds = array<i64: 1, 128>}, {transform_indices = @transform_7, window_bounds = array<i64: 16, 128>}]} {
    %c0 = arith.constant 0 : index
    %c0_0 = arith.constant 0 : index
    %0 = vector.load %arg1[%c0, %c0_0] : memref<16x32xf32, #tpu.memory_space<vmem>>, vector<16x32xf32>
    %c0_1 = arith.constant 0 : index
    %c0_2 = arith.constant 0 : index
    %1 = vector.load %arg2[%c0_1, %c0_2] : memref<32x64xbf16, #tpu.memory_space<vmem>>, vector<32x64xbf16>
    %c0_3 = arith.constant 0 : index
    %c0_4 = arith.constant 0 : index
    %2 = vector.load %arg3[%c0_3, %c0_4] : memref<1x64xf32, #tpu.memory_space<vmem>>, vector<1x64xf32>
    %3 = arith.truncf %0 : vector<16x32xf32> to vector<16x32xbf16>
    %cst = arith.constant dense<0.000000e+00> : vector<16x64xf32>
    %4 = tpu.matmul %3, %1, %cst {dimension_numbers = #tpu.dot_dimension_numbers<[1], [0], [0], [1], [0, 0, 1, 1], [], []>} : vector<16x32xbf16>, vector<32x64xbf16>, vector<16x64xf32> -> vector<16x64xf32>
    %5 = vector.broadcast %2 : vector<1x64xf32> to vector<16x64xf32>
    %6 = arith.addf %4, %5 : vector<16x64xf32>
    %cst_5 = arith.constant 0.000000e+00 : f32
    %7 = vector.broadcast %cst_5 : f32 to vector<16x64xf32>
    %8 = arith.subf %7, %6 : vector<16x64xf32>
    %9 = math.exp %8 : vector<16x64xf32>
    %cst_6 = arith.constant 1.000000e+00 : f32
    %10 = vector.broadcast %cst_6 : f32 to vector<16x64xf32>
    %11 = arith.addf %10, %9 : vector<16x64xf32>
    %cst_7 = arith.constant 1.000000e+00 : f32
    %12 = vector.broadcast %cst_7 : f32 to vector<16x64xf32>
    %13 = arith.divf %12, %11 : vector<16x64xf32>
    %14 = arith.mulf %6, %13 : vector<16x64xf32>
    %c0_8 = arith.constant 0 : index
    %c0_9 = arith.constant 0 : index
    %15 = vector.load %arg4[%c0_8, %c0_9] : memref<64x64xbf16, #tpu.memory_space<vmem>>, vector<64x64xbf16>
    %c0_10 = arith.constant 0 : index
    %c0_11 = arith.constant 0 : index
    %16 = vector.load %arg5[%c0_10, %c0_11] : memref<1x64xf32, #tpu.memory_space<vmem>>, vector<1x64xf32>
    %17 = arith.truncf %14 : vector<16x64xf32> to vector<16x64xbf16>
    %cst_12 = arith.constant dense<0.000000e+00> : vector<16x64xf32>
    %18 = tpu.matmul %17, %15, %cst_12 {dimension_numbers = #tpu.dot_dimension_numbers<[1], [0], [0], [1], [0, 0, 1, 1], [], []>} : vector<16x64xbf16>, vector<64x64xbf16>, vector<16x64xf32> -> vector<16x64xf32>
    %19 = vector.broadcast %16 : vector<1x64xf32> to vector<16x64xf32>
    %20 = arith.addf %18, %19 : vector<16x64xf32>
    %cst_13 = arith.constant 0.000000e+00 : f32
    %21 = vector.broadcast %cst_13 : f32 to vector<16x64xf32>
    %22 = arith.subf %21, %20 : vector<16x64xf32>
    %23 = math.exp %22 : vector<16x64xf32>
    %cst_14 = arith.constant 1.000000e+00 : f32
    %24 = vector.broadcast %cst_14 : f32 to vector<16x64xf32>
    %25 = arith.addf %24, %23 : vector<16x64xf32>
    %cst_15 = arith.constant 1.000000e+00 : f32
    %26 = vector.broadcast %cst_15 : f32 to vector<16x64xf32>
    %27 = arith.divf %26, %25 : vector<16x64xf32>
    %28 = arith.mulf %20, %27 : vector<16x64xf32>
    %c0_16 = arith.constant 0 : index
    %c0_17 = arith.constant 0 : index
    %29 = vector.load %arg6[%c0_16, %c0_17] : memref<64x128xbf16, #tpu.memory_space<vmem>>, vector<64x128xbf16>
    %c0_18 = arith.constant 0 : index
    %c0_19 = arith.constant 0 : index
    %30 = vector.load %arg7[%c0_18, %c0_19] : memref<1x128xf32, #tpu.memory_space<vmem>>, vector<1x128xf32>
    %31 = arith.truncf %28 : vector<16x64xf32> to vector<16x64xbf16>
    %cst_20 = arith.constant dense<0.000000e+00> : vector<16x128xf32>
    %32 = tpu.matmul %31, %29, %cst_20 {dimension_numbers = #tpu.dot_dimension_numbers<[1], [0], [0], [1], [0, 0, 1, 1], [], []>} : vector<16x64xbf16>, vector<64x128xbf16>, vector<16x128xf32> -> vector<16x128xf32>
    %33 = vector.broadcast %30 : vector<1x128xf32> to vector<16x128xf32>
    %34 = arith.addf %32, %33 : vector<16x128xf32>
    %35 = tpu.iota {dimensions = array<i32: 1>} : vector<16x128xi32>
    %cst_21 = arith.constant -9.000000e+00 : f32
    %cst_22 = arith.constant 9.000000e+00 : f32
    %36 = vector.broadcast %cst_21 : f32 to vector<16x128xf32>
    %37 = arith.maximumf %36, %34 : vector<16x128xf32>
    %38 = vector.broadcast %cst_22 : f32 to vector<16x128xf32>
    %39 = arith.minimumf %38, %37 : vector<16x128xf32>
    %cst_23 = arith.constant -5.000000e+00 : f32
    %cst_24 = arith.constant 2.000000e+00 : f32
    %40 = vector.broadcast %cst_23 : f32 to vector<16x128xf32>
    %41 = arith.maximumf %40, %34 : vector<16x128xf32>
    %42 = vector.broadcast %cst_24 : f32 to vector<16x128xf32>
    %43 = arith.minimumf %42, %41 : vector<16x128xf32>
    %44 = math.exp %43 : vector<16x128xf32>
    %c8_i32 = arith.constant 8 : i32
    %45 = vector.broadcast %c8_i32 : i32 to vector<16x128xi32>
    %46 = arith.cmpi slt, %35, %45 : vector<16x128xi32>
    %c16_i32 = arith.constant 16 : i32
    %47 = vector.broadcast %c16_i32 : i32 to vector<16x128xi32>
    %48 = arith.cmpi slt, %35, %47 : vector<16x128xi32>
    %49 = arith.select %48, %44, %34 : vector<16x128xi1>, vector<16x128xf32>
    %50 = arith.select %46, %39, %49 : vector<16x128xi1>, vector<16x128xf32>
    %c0_25 = arith.constant 0 : index
    %c0_26 = arith.constant 0 : index
    %51 = vector.load %arg8[%c0_25, %c0_26] : memref<16x128xf32, #tpu.memory_space<vmem>>, vector<16x128xf32>
    tpu.vector_store %arg8[%c0_25, %c0_26], %50 {strides = array<i32>} : memref<16x128xf32, #tpu.memory_space<vmem>>, vector<16x128xf32>,
    return
  }
  func.func @transform_0(%arg0: i32) -> (i32, i32) {
    %c0_i32 = arith.constant 0 : i32
    %c0_i32_0 = arith.constant 0 : i32
    return %arg0, %c0_i32 : i32, i32
  }
  func.func @transform_1(%arg0: i32) -> (i32, i32) {
    %c0_i32 = arith.constant 0 : i32
    %c0_i32_0 = arith.constant 0 : i32
    %c0_i32_1 = arith.constant 0 : i32
    return %c0_i32, %c0_i32_0 : i32, i32
  }
  func.func @transform_2(%arg0: i32) -> (i32, i32) {
    %c0_i32 = arith.constant 0 : i32
    %c0_i32_0 = arith.constant 0 : i32
    %c0_i32_1 = arith.constant 0 : i32
    return %c0_i32, %c0_i32_0 : i32, i32
  }
  func.func @transform_3(%arg0: i32) -> (i32, i32) {
    %c0_i32 = arith.constant 0 : i32
    %c0_i32_0 = arith.constant 0 : i32
    %c0_i32_1 = arith.constant 0 : i32
    return %c0_i32, %c0_i32_0 : i32, i32
  }
  func.func @transform_4(%arg0: i32) -> (i32, i32) {
    %c0_i32 = arith.constant 0 : i32
    %c0_i32_0 = arith.constant 0 : i32
    %c0_i32_1 = arith.constant 0 : i32
    return %c0_i32, %c0_i32_0 : i32, i32
  }
  func.func @transform_5(%arg0: i32) -> (i32, i32) {
    %c0_i32 = arith.constant 0 : i32
    %c0_i32_0 = arith.constant 0 : i32
    %c0_i32_1 = arith.constant 0 : i32
    return %c0_i32, %c0_i32_0 : i32, i32
  }
  func.func @transform_6(%arg0: i32) -> (i32, i32) {
    %c0_i32 = arith.constant 0 : i32
    %c0_i32_0 = arith.constant 0 : i32
    %c0_i32_1 = arith.constant 0 : i32
    return %c0_i32, %c0_i32_0 : i32, i32
  }
  func.func @transform_7(%arg0: i32) -> (i32, i32) {
    %c0_i32 = arith.constant 0 : i32
    %c0_i32_0 = arith.constant 0 : i32
    return %arg0, %c0_i32 : i32, i32
  }
}

</mosaic_0001>

<bundles_post_ra>
// kernel: mlp_policy_forward.1
= control target key start
LH: loop header
LB: loop body
LE: loop exit
PB: predicated region body
PF: predicated region fallthrough
CT: control target
= control target key end

     0   :  { %v416_v0 = vmov 0.0   ;;  %vm417_vm0 = vmmov 0   ;;  %vm53_vm1 = vcmask 261120   ;;  %vm152_vm2 = vcmask 523264   ;;  %s524_s1 = inlined_call_operand.vmem [shape: bf16[32,64], index: 1, kind: input, shape index: {}]   ;;  %s525_s0 = inlined_call_operand.vmem [shape: f32[16,32], index: 0, kind: input, shape index: {}]   ;;  %s526_s3 = inlined_call_operand.vmem [shape: bf16[64,64], index: 3, kind: input, shape index: {}]   ;;  %s527_s2 = inlined_call_operand.vmem [shape: f32[1,64], index: 2, kind: input, shape index: {}]   ;;  %s528_s5 = inlined_call_operand.vmem [shape: bf16[64,128], index: 5, kind: input, shape index: {}]   ;;  %s529_s4 = inlined_call_operand.vmem [shape: f32[1,64], index: 4, kind: input, shape index: {}]   ;;  %s530_s6 = inlined_call_operand.vmem [shape: f32[1,128], index: 6, kind: input, shape index: {}]   ;;  %s531_s7 = inlined_call_operand.vmem [shape: f32[16,128], index: 7, kind: output, shape index: {}]  }
   0x1   :  { %352 = vmatprep.subr.bf16.mxu0 %v416_v0  ;;  %v386_v1 = vld [vmem:[%s524_s1] sm:$0xff]   ;;  %356 = vmatprep.mubr.msk.bf16.mxu0 %vm417_vm0, %v416_v0  ;;  %v387_v2 = vld [vmem:[%s524_s1 + $0x8] sm:$0xff]   ;;  %v390_v8 = vld [vmem:[%s526_s3 + $0x10] sm:$0xff]  }
   0x2   :  { %360 = vmatprep.subr.bf16.mxu1 %v416_v0  ;;  %368 = vmatprep.mubr.msk.bf16.mxu1 %vm417_vm0, %v416_v0  ;;  %v27_v3 = vld [vmem:[%s525_s0] sm:$0xff]  ;;  %v28_v4 = vld [vmem:[%s525_s0 + $0x8] sm:$0xff]  ;;  %v391_v9 = vld [vmem:[%s526_s3 + $0x18] sm:$0xff]  }
   0x3   :  { %353 = vmatpush3.bf16.msra.mxu0 %v386_v1  ;;  %v34_v5 = vpack.c.bf16 %v28_v4, %v27_v3  ;;  %v388_v6 = vld [vmem:[%s526_s3] sm:$0xff]   ;;  %v389_v7 = vld [vmem:[%s526_s3 + $0x8] sm:$0xff]   ;;  %v394_v32 = vld [vmem:[%s528_s5 + $0x10] sm:$0xff]  }
   0x4   :  { %354 = vmatprep.subr.bf16.mxu0 %v416_v0  ;;  %361 = vmatpush3.bf16.msra.mxu1 %v388_v6  ;;  %v321_v10 = vld [vmem:[%s527_s2] ss:$0 sm:$0xff]  ;;  %v393_v31 = vld [vmem:[%s528_s5 + $0x8] sm:$0xff]   ;;  %v395_v33 = vld [vmem:[%s528_s5 + $0x18] sm:$0xff]  }
   0x5   :  { %362 = vmatprep.subr.bf16.mxu1 %v416_v0  ;;  %v392_v30 = vld [vmem:[%s528_s5] sm:$0xff]  }
   0x6   :  { %v325_v34 = vld [vmem:[%s529_s4] ss:$0 sm:$0xff] }
   0x7   :  { %355 = vmatpush3.bf16.msra.mxu0 %v387_v2  ;;  %v331_v54 = vld [vmem:[%s530_s6] ss:$0 sm:$0xff]  ;;  %v295_v2 = vlaneseq }
   0x8   :  { %372 = vmatprep.subr.bf16.mxu0 %v416_v0  ;;  %363 = vmatpush3.bf16.msra.mxu1 %v389_v7 }
   0x9   :  { %364 = vmatprep.subr.bf16.mxu1 %v416_v0  ;;  %v296_v4 = vand.u32 127, %v295_v2 }
   0xa   :  { %357 = vmatmul.mubr.msk.bf16.vlgmr.msra.gmra.mrb[0].mxu0 %vm53_vm1, %v34_v5 }
   0xb   :  { %380 = vmatprep.mubr.msk.bf16.mxu0 %vm417_vm0, %v416_v0  ;;  %373 = vmatpush3.bf16.msra.mxu0 %v392_v30  ;;  %vm310_vm3 = vcmp.lt.s32.totalorder %v296_v4, 16  ;;  %vm309_vm4 = vcmp.lt.s32.totalorder %v296_v4, 8 }
   0xc   :  { %365 = vmatpush3.bf16.msra.mxu1 %v390_v8  ;;  %374 = vmatprep.subr.bf16.mxu0 %v416_v0 }
   0xd   :  { %366 = vmatprep.subr.bf16.mxu1 %v416_v0 }
   0xf   :  { %375 = vmatpush3.bf16.msra.mxu0 %v393_v31 }
  0x10   :  { %367 = vmatpush3.bf16.msra.mxu1 %v391_v9  ;;  %376 = vmatprep.subr.bf16.mxu0 %v416_v0 }
  0x13   :  { %377 = vmatpush3.bf16.msra.mxu0 %v394_v32 }
  0x14   :  { %378 = vmatprep.subr.bf16.mxu0 %v416_v0 }
  0x17   :  { %379 = vmatpush3.bf16.msra.mxu0 %v395_v33 }
  0xdd   :  { %v91_v11 = vpop.f32.mrb[0].mxu0 }
  0xde   :  { %v92_v12 = vadd.f32 %v321_v10, %v91_v11  ;;  %v358_v13 = vpop.f32.mrb[1].mxu0 }
  0xdf   :  { %v94_v14 = vpop.f32.mrb[2].mxu0 }
  0xe0   :  { %v98_v15 = vsub.f32 0.0, %v92_v12  ;;  %v95_v16 = vadd.f32 %v321_v10, %v94_v14  ;;  %v359_v17 = vpop.f32.mrb[3].mxu0 }
  0xe2   :  { %v100_v18 = vmul.f32 1.442695, %v98_v15  ;;  %v99_v19 = vsub.f32 0.0, %v95_v16 }
  0xe4   :  { %396 = vpow2.f32 %v100_v18  ;;  %v102_v20 = vmul.f32 1.442695, %v99_v19 }
  0xe6   :  { %398 = vpow2.f32 %v102_v20 }
  0xee   :  { %v397_v21 = vpop.eup %396 }
  0xef   :  { %v104_v22 = vadd.f32 1.0, %v397_v21 }
  0xf0   :  { %v399_v23 = vpop.eup %398 }
  0xf1   :  { %400 = vrcp.f32 %v104_v22  ;;  %v105_v24 = vadd.f32 1.0, %v399_v23 }
  0xf3   :  { %402 = vrcp.f32 %v105_v24 }
  0xfb   :  { %v401_v25 = vpop.eup %400 }
  0xfc   :  { %v110_v27 = vmul.f32 %v401_v25, %v92_v12 }
  0xfd   :  { %v403_v26 = vpop.eup %402 }
  0xfe   :  { %v111_v28 = vmul.f32 %v403_v26, %v95_v16 }
 0x100   :  { %v121_v29 = vpack.c.bf16 %v111_v28, %v110_v27 }
 0x102   :  { %369 = vmatmul.mubr.msk.bf16.vlgmr.msra.gmra.mrb[0].mxu1 %vm152_vm2, %v121_v29 }
 0x1d5   :  { %v190_v35 = vpop.f32.mrb[0].mxu1 }
 0x1d6   :  { %v191_v36 = vadd.f32 %v325_v34, %v190_v35  ;;  %v370_v37 = vpop.f32.mrb[1].mxu1 }
 0x1d7   :  { %v193_v38 = vpop.f32.mrb[2].mxu1 }
 0x1d8   :  { %v197_v39 = vsub.f32 0.0, %v191_v36  ;;  %v194_v40 = vadd.f32 %v325_v34, %v193_v38  ;;  %v371_v41 = vpop.f32.mrb[3].mxu1 }
 0x1da   :  { %v199_v42 = vmul.f32 1.442695, %v197_v39  ;;  %v198_v43 = vsub.f32 0.0, %v194_v40 }
 0x1dc   :  { %404 = vpow2.f32 %v199_v42  ;;  %v201_v44 = vmul.f32 1.442695, %v198_v43 }
 0x1de   :  { %406 = vpow2.f32 %v201_v44 }
 0x1e6   :  { %v405_v45 = vpop.eup %404 }
 0x1e7   :  { %v203_v46 = vadd.f32 1.0, %v405_v45 }
 0x1e8   :  { %v407_v47 = vpop.eup %406 }
 0x1e9   :  { %408 = vrcp.f32 %v203_v46  ;;  %v204_v48 = vadd.f32 1.0, %v407_v47 }
 0x1eb   :  { %410 = vrcp.f32 %v204_v48 }
 0x1f3   :  { %v409_v49 = vpop.eup %408 }
 0x1f4   :  { %v209_v51 = vmul.f32 %v409_v49, %v191_v36 }
 0x1f5   :  { %v411_v50 = vpop.eup %410 }
 0x1f6   :  { %v210_v52 = vmul.f32 %v411_v50, %v194_v40 }
 0x1f8   :  { %v220_v53 = vpack.c.bf16 %v210_v52, %v209_v51 }
 0x1fa   :  { %381 = vmatmul.mubr.msk.bf16.vlgmr.msra.gmra.mrb[4].mxu0 %vm152_vm2, %v220_v53 }
 0x2cd   :  { %v288_v55 = vpop.f32.mrb[4].mxu0 }
 0x2ce   :  { %v289_v56 = vadd.f32 %v331_v54, %v288_v55  ;;  %v382_v57 = vpop.f32.mrb[5].mxu0 }
 0x2cf   :  { %v291_v58 = vpop.f32.mrb[6].mxu0 }
 0x2d0   :  { %v301_v59 = vmax.f32 %v289_v56, -5.0  ;;  %v292_v60 = vadd.f32 %v331_v54, %v291_v58  ;;  %v383_v61 = vpop.f32.mrb[7].mxu0  ;;  %v337_v6 = vclamps-f32 %v289_v56, 9.0 }
 0x2d2   :  { %v303_v62 = vmin.f32 %v301_v59, 2.0  ;;  %v302_v63 = vmax.f32 %v292_v60, -5.0  ;;  %v338_v10 = vclamps-f32 %v292_v60, 9.0 }
 0x2d4   :  { %v305_v0 = vmul.f32 1.442695, %v303_v62  ;;  %v304_v1 = vmin.f32 %v302_v63, 2.0 }
 0x2d6   :  { %412 = vpow2.f32 %v305_v0  ;;  %v307_v3 = vmul.f32 1.442695, %v304_v1 }
 0x2d8   :  { %414 = vpow2.f32 %v307_v3 }
 0x2e0   :  { %v413_v5 = vpop.eup %412 }
 0x2e1   :  { %v311_v7 = vsel %vm310_vm3, %v413_v5, %v289_v56 }
 0x2e2   :  { %v415_v8 = vpop.eup %414  ;;  %v313_v9 = vsel %vm309_vm4, %v337_v6, %v311_v7 }
 0x2e3   :  { %315 = vst [vmem:[%s531_s7] sm:$0xff] %v313_v9  ;;  %v312_v11 = vsel %vm310_vm3, %v415_v8, %v292_v60 }
 0x2e4   :  { %v314_v12 = vsel %vm309_vm4, %v338_v10, %v312_v11 }
 0x2e5   :  { %316 = vst [vmem:[%s531_s7 + $0x8] sm:$0xff] %v314_v12 }

</bundles_post_ra>
